<compile_context>
chip_gen: v7x
topology: tpu7x:2x2x1
jax: 0.10.0
libtpu: 0.0.40
codegen_flags: <defaults>
</compile_context>

<pallas_src>
import functools

import jax
import jax.numpy as jnp
from jax.experimental import pallas as pl
from jax.experimental.pallas import tpu as pltpu

LANES = 128
# 2048 rows x 128 lanes x 4 B = 1 MiB per input per pipeline buffer
# -> 2 inputs x 2 buffers = 4 MiB VMEM: comfortably fits the default scoped
# VMEM on v5e (16 MiB), v6e (32 MiB) and v7x (32 MiB of 64 MiB physical).
MAX_BLOCK_ROWS = 2048
SUBLANES = 8


@functools.partial(jax.jit, static_argnames=("codebook_weight",))
def vq_loss(codebook_loss, inputs, reconstructions, codebook_weight=1.0):
    """JAX/Pallas equivalent of VQLoss.forward (optimizer_idx / global_step /
    split do not affect the math)."""
    assert inputs.shape == reconstructions.shape

    n_elems = inputs.size

    # Flatten. For contiguous arrays this is free (no HBM traffic).
    x_flat = inputs.reshape(-1)
    r_flat = reconstructions.reshape(-1)

    # Rare path: element count not a multiple of the lane width. Pad minimally
    # so the lane-dense reshape is legal (zero tail contributes |0-0| = 0).
    if n_elems % LANES != 0:
        pad = LANES - (n_elems % LANES)
        x_flat = jnp.pad(x_flat, (0, pad))
        r_flat = jnp.pad(r_flat, (0, pad))

    rows = x_flat.size // LANES
    x2 = x_flat.reshape(rows, LANES)
    r2 = r_flat.reshape(rows, LANES)

    # Block sizing: as large as MAX_BLOCK_ROWS, but never exceed the (8-row
    # rounded) slab so small inputs still satisfy the (8, 128) rule.
    block_rows = min(MAX_BLOCK_ROWS, ((rows + SUBLANES - 1) // SUBLANES) * SUBLANES)
    num_blocks = pl.cdiv(rows, block_rows)
    needs_mask = (rows % block_rows) != 0  # static: tail block exists

    def kernel(x_ref, r_ref, out_ref):
        # Upcast inside the kernel (keeps HBM traffic at source dtype width).
        diff = jnp.abs(x_ref[...].astype(jnp.float32)
                       - r_ref[...].astype(jnp.float32))
        if needs_mask:
            row = jax.lax.broadcasted_iota(jnp.int32, diff.shape, 0)
            valid = (pl.program_id(0) * block_rows + row) < rows
            diff = jnp.where(valid, diff, jnp.float32(0.0))
        # Per-vreg partial sums: pure VPU adds across sublane groups; the
        # single cross-lane reduce happens in the wrapper on a tiny slab.
        partial = diff.reshape(block_rows // SUBLANES, SUBLANES, LANES).sum(axis=0)
        out_ref[0] = partial

    partials = pl.pallas_call(
        kernel,
        out_shape=jax.ShapeDtypeStruct((num_blocks, SUBLANES, LANES), jnp.float32),
        grid_spec=pltpu.PrefetchScalarGridSpec(
            num_scalar_prefetch=0,
            grid=(num_blocks,),
            in_specs=[
                pl.BlockSpec((block_rows, LANES), lambda i: (i, 0)),
                pl.BlockSpec((block_rows, LANES), lambda i: (i, 0)),
            ],
            out_specs=pl.BlockSpec((1, SUBLANES, LANES), lambda i: (i, 0, 0)),
        ),
        compiler_params=pltpu.CompilerParams(
            # Independent per-block partials -> parallel axis (v7x: both TCs).
            dimension_semantics=("parallel",)),
    )(x2, r2)

    nll_loss = jnp.sum(partials) / jnp.float32(n_elems)            # mean(|x - r|)
    cb_mean = jnp.mean(codebook_loss.astype(jnp.float32))          # codebook_loss.mean()
    loss = nll_loss + jnp.float32(codebook_weight) * cb_mean

    log = {
        "loss_total": loss,       # scalar; .mean() of a scalar is itself
        "loss_codebook": cb_mean,
        "loss_nll": nll_loss,
        "loss_rec": nll_loss,     # mean(rec_loss) == nll_loss here
    }
    return loss, log


if __name__ == "__main__":
    key = jax.random.PRNGKey(0)
    k1, k2, k3 = jax.random.split(key, 3)

    B, C, H, W = 2, 4, 16, 16
    inputs = jax.random.normal(k1, (B, C, H, W), jnp.float32)
    reconstructions = jax.random.normal(k2, (B, C, H, W), jnp.float32)
    codebook_loss = jnp.abs(jax.random.normal(k3, (B,), jnp.float32))

    loss, log = vq_loss(codebook_loss, inputs, reconstructions,
                        codebook_weight=1.0)
    jax.block_until_ready(loss)

    # Reference check in plain JAX.
    rec = jnp.abs(inputs - reconstructions)
    ref_nll = jnp.mean(rec)
    ref_loss = ref_nll + 1.0 * jnp.mean(codebook_loss)
    assert jnp.allclose(loss, ref_loss, rtol=1e-5, atol=1e-5), (loss, ref_loss)
    assert jnp.allclose(log["loss_nll"], ref_nll, rtol=1e-5, atol=1e-5)
    assert jnp.allclose(log["loss_codebook"], jnp.mean(codebook_loss),
                        rtol=1e-5, atol=1e-5)

    print("KERNEL_OK")
</pallas_src>

<mosaic_0001>
module attributes {stable_mosaic.version = 11 : i64} {
  func.func @kernel(%arg0: i32, %arg1: memref<16x128xf32, #tpu.memory_space<vmem>>, %arg2: memref<16x128xf32, #tpu.memory_space<vmem>>, %arg3: memref<1x8x128xf32, #tpu.memory_space<vmem>>) attributes {dimension_semantics = [#tpu.dimension_semantics<parallel>], iteration_bounds = array<i64: 1>, scalar_prefetch = 0 : i64, scratch_operands = 0 : i64, tpu.core_type = #tpu.core_type<tc>, window_params = [{transform_indices = @transform_0, window_bounds = array<i64: 16, 128>}, {transform_indices = @transform_1, window_bounds = array<i64: 16, 128>}, {transform_indices = @transform_2, window_bounds = array<i64: 1, 8, 128>}]} {
    %c0 = arith.constant 0 : index
    %c0_0 = arith.constant 0 : index
    %0 = vector.load %arg1[%c0, %c0_0] : memref<16x128xf32, #tpu.memory_space<vmem>>, vector<16x128xf32>
    %c0_1 = arith.constant 0 : index
    %c0_2 = arith.constant 0 : index
    %1 = vector.load %arg2[%c0_1, %c0_2] : memref<16x128xf32, #tpu.memory_space<vmem>>, vector<16x128xf32>
    %2 = arith.subf %0, %1 : vector<16x128xf32>
    %3 = math.absf %2 : vector<16x128xf32>
    %4 = vector.shape_cast %3 : vector<16x128xf32> to vector<2x8x128xf32>
    %cst = arith.constant dense<0.000000e+00> : vector<8x128xf32>
    %5 = vector.multi_reduction <add>, %4, %cst [0] : vector<2x8x128xf32> to vector<8x128xf32>
    %c0_3 = arith.constant 0 : index
    %c0_4 = arith.constant 0 : index
    %c0_5 = arith.constant 0 : index
    %6 = vector.load %arg3[%c0_3, %c0_4, %c0_5] : memref<1x8x128xf32, #tpu.memory_space<vmem>>, vector<1x8x128xf32>
    %7 = vector.shape_cast %6 : vector<1x8x128xf32> to vector<8x128xf32>
    %8 = vector.shape_cast %5 : vector<8x128xf32> to vector<1x8x128xf32>
    tpu.vector_store %arg3[%c0_3, %c0_4, %c0_5], %8 {strides = array<i32>} : memref<1x8x128xf32, #tpu.memory_space<vmem>>, vector<1x8x128xf32>,
    return
  }
  func.func @transform_0(%arg0: i32) -> (i32, i32) {
    %c0_i32 = arith.constant 0 : i32
    %c0_i32_0 = arith.constant 0 : i32
    return %arg0, %c0_i32 : i32, i32
  }
  func.func @transform_1(%arg0: i32) -> (i32, i32) {
    %c0_i32 = arith.constant 0 : i32
    %c0_i32_0 = arith.constant 0 : i32
    return %arg0, %c0_i32 : i32, i32
  }
  func.func @transform_2(%arg0: i32) -> (i32, i32, i32) {
    %c0_i32 = arith.constant 0 : i32
    %c0_i32_0 = arith.constant 0 : i32
    %c0_i32_1 = arith.constant 0 : i32
    return %arg0, %c0_i32, %c0_i32_0 : i32, i32, i32
  }
}

</mosaic_0001>

<bundles_post_ra>
// kernel: vq_loss.1
= control target key start
LH: loop header
LB: loop body
LE: loop exit
PB: predicated region body
PF: predicated region fallthrough
CT: control target
= control target key end

     0   :  { %s55_s0 = inlined_call_operand.vmem [shape: f32[16,128], index: 0, kind: input, shape index: {}]   ;;  %s56_s1 = inlined_call_operand.vmem [shape: f32[16,128], index: 1, kind: input, shape index: {}]   ;;  %s57_s2 = inlined_call_operand.vmem [shape: f32[1,8,128], index: 2, kind: output, shape index: {}]  }
   0x1   :  { %v11_v0 = vld [vmem:[%s55_s0] sm:$0xff]  ;;  %v12_v1 = vld [vmem:[%s55_s0 + $0x8] sm:$0xff] }
   0x2   :  { %v13_v2 = vld [vmem:[%s56_s1] sm:$0xff]  ;;  %v14_v3 = vld [vmem:[%s56_s1 + $0x8] sm:$0xff] }
   0x3   :  { %v15_v4 = vsub.f32 %v11_v0, %v13_v2  ;;  %v16_v5 = vsub.f32 %v12_v1, %v14_v3 }
   0x5   :  { %v17_v6 = vand.u32 2147483647, %v15_v4  ;;  %v18_v7 = vand.u32 2147483647, %v16_v5 }
   0x7   :  { %v19_v8 = vadd.f32 %v18_v7, %v17_v6 }
   0x9   :  { %20 = vst [vmem:[%s57_s2] sm:$0xff] %v19_v8 }

</bundles_post_ra>
